<compile_context>
chip_gen: v7x
topology: tpu7x:2x2x1
jax: 0.10.0
libtpu: 0.0.40
codegen_flags: <defaults>
</compile_context>

<pallas_src>
import math

import jax
import jax.numpy as jnp
import numpy as np
from jax.experimental import pallas as pl
from jax.experimental.pallas import tpu as pltpu

SCALE_SUM = 1.25            # "fitted" ScaleFactor scalar (synthetic, deterministic)
INV_SQRT_2 = 1.0 / math.sqrt(2.0)
SILU_SCALE = 1.0 / 0.6      # ScaledSiLU scale used by GemNet-OC Dense


def _scaled_silu(x):
    return jax.nn.silu(x) * SILU_SCALE


def _round_up(x, m):
    return (x + m - 1) // m * m


def _const_spec(block_shape, index_map):
    """BlockSpec for a constant-index weight block; single-buffer it if supported."""
    try:
        return pl.BlockSpec(block_shape, index_map,
                            pipeline_mode=pl.Buffered(buffer_count=1))
    except Exception:  # older Pallas without pipeline_mode / Buffered
        return pl.BlockSpec(block_shape, index_map)


def _vmem_limit_bytes():
    """Generation-aware scoped-VMEM limit (64 MiB on v5e/v6e, 32 MiB on v7x)."""
    try:
        cap = int(pltpu.get_tpu_info().vmem_capacity_bytes)
    except Exception:
        cap = 64 << 20          # conservative (v7x-sized) fallback
    return min(cap // 2, 96 << 20)


# ---------------------------------------------------------------------------
# Pass 1: per-edge transform  x = m * (basis_rad @ W_rbf)   (edge-parallel)
# ---------------------------------------------------------------------------
def _edge_transform(basis, m, w_rbf, *, tile_e, compute_dtype, vmem_limit):
    n_edges_pad, emb_rbf = basis.shape
    emb_edge = m.shape[1]

    def kernel(basis_ref, m_ref, wrbf_ref, x_ref):
        bases = jnp.dot(basis_ref[...], wrbf_ref[...],
                        preferred_element_type=jnp.float32)
        x_ref[...] = (m_ref[...].astype(jnp.float32) * bases).astype(x_ref.dtype)

    return pl.pallas_call(
        kernel,
        out_shape=jax.ShapeDtypeStruct((n_edges_pad, emb_edge), compute_dtype),
        grid_spec=pltpu.PrefetchScalarGridSpec(
            num_scalar_prefetch=0,
            grid=(n_edges_pad // tile_e,),
            in_specs=[pl.BlockSpec((tile_e, emb_rbf), lambda e: (e, 0)),
                      pl.BlockSpec((tile_e, emb_edge), lambda e: (e, 0)),
                      _const_spec((emb_rbf, emb_edge), lambda e: (0, 0))],
            out_specs=pl.BlockSpec((tile_e, emb_edge), lambda e: (e, 0))),
        compiler_params=pltpu.CompilerParams(
            dimension_semantics=("parallel",),
            vmem_limit_bytes=vmem_limit),
    )(basis, m, w_rbf)


# ---------------------------------------------------------------------------
# Pass 2: sorted-edge scatter-add + ScaleFactor + dense1 + residual MLP
# ---------------------------------------------------------------------------
def _make_scatter_kernel(tile_a, n_hidden, use_dense1, compute_dtype):
    def kernel(*refs):
        it = iter(refs)
        sched_ref = next(it)    # (5, n_work)  SMEM: [slab, etile, first, last, valid]
        idx_ref = next(it)      # (1, TILE_E)  int32 (sorted)
        x_ref = next(it)        # (TILE_E, emb_edge)  compute_dtype (sorted)
        w1_ref = next(it) if use_dense1 else None
        wres_ref = next(it) if n_hidden > 0 else None
        out_ref = next(it)      # (TILE_A, emb_atom) f32
        acc_ref = next(it)      # (TILE_A, emb_edge) f32 scratch

        w = pl.program_id(0)
        slab = sched_ref[0, w]
        is_first = sched_ref[2, w] == 1
        is_last = sched_ref[3, w] == 1
        is_valid = sched_ref[4, w] == 1

        # Slab with no overlapping edge tile: just zero the accumulator once.
        @pl.when(jnp.logical_and(is_first, jnp.logical_not(is_valid)))
        def _zero():
            acc_ref[...] = jnp.zeros_like(acc_ref)

        @pl.when(is_valid)
        def _accumulate():
            # Cheap one-hot: shift the (1, TILE_E) index vector, not the big iota.
            idx_local = idx_ref[...] - slab * tile_a                  # (1, TILE_E)
            rows = jax.lax.broadcasted_iota(
                jnp.int32, (tile_a, idx_local.shape[-1]), 0)
            onehot = (rows == idx_local).astype(compute_dtype)
            contrib = jnp.dot(onehot, x_ref[...],
                              preferred_element_type=jnp.float32)

            @pl.when(is_first)
            def _store():                       # avoids zero-then-RMW on step 0
                acc_ref[...] = contrib

            @pl.when(jnp.logical_not(is_first))
            def _add():
                acc_ref[...] = acc_ref[...] + contrib

        # Epilogue once per atom slab: ScaleFactor + dense1 + residual MLP.
        @pl.when(is_last)
        def _epilogue():
            x2 = acc_ref[...] * SCALE_SUM
            if use_dense1:
                x2 = _scaled_silu(jnp.dot(x2.astype(compute_dtype), w1_ref[...],
                                          preferred_element_type=jnp.float32))
            for i in range(n_hidden):
                y = _scaled_silu(jnp.dot(x2.astype(compute_dtype), wres_ref[2 * i],
                                         preferred_element_type=jnp.float32))
                y = _scaled_silu(jnp.dot(y.astype(compute_dtype), wres_ref[2 * i + 1],
                                         preferred_element_type=jnp.float32))
                x2 = (x2 + y) * INV_SQRT_2
            out_ref[...] = x2.astype(out_ref.dtype)

    return kernel


def atom_update_block(h, m, basis_rad, idx_atom, w_rbf, w1, w_res, n_hidden,
                      *, compute_dtype=jnp.bfloat16, tile_e=None, tile_a=None):
    """Pallas AtomUpdateBlock forward. h is only used for nAtoms (as in PyTorch)."""
    n_atoms = h.shape[0]
    n_edges, emb_size_edge = m.shape
    emb_size_rbf = basis_rad.shape[1]
    use_dense1 = w1 is not None
    if use_dense1:
        emb_size_atom = w1.shape[1]
    elif n_hidden > 0:
        emb_size_atom = w_res.shape[-1]
    else:
        emb_size_atom = emb_size_edge
    itemsize = jnp.dtype(compute_dtype).itemsize

    vmem_limit = _vmem_limit_bytes()
    budget = int(vmem_limit * 0.6)

    # ---- atom-slab tile ----
    if tile_a is None:
        tile_a = min(_round_up(n_atoms, 8), 128)
    tile_a = _round_up(tile_a, 8)
    n_atoms_pad = _round_up(n_atoms, tile_a)
    n_atom_tiles = n_atoms_pad // tile_a

    weights_bytes = emb_size_rbf * emb_size_edge * itemsize
    if use_dense1:
        weights_bytes += emb_size_edge * emb_size_atom * itemsize
    if n_hidden > 0:
        weights_bytes += 2 * n_hidden * emb_size_atom * emb_size_atom * itemsize

    # ---- edge tile (largest candidate fitting the generation-aware budget) ----
    if tile_e is None:
        e_cap = _round_up(n_edges, 128)
        tile_e = 128
        for cand in (4096, 2048, 1024, 512, 256, 128):
            t = min(cand, e_cap)
            need = (2 * t * emb_size_edge * itemsize        # x tile (double-buffered)
                    + 2 * t * 4                             # idx tile
                    + tile_a * emb_size_edge * 4            # f32 accumulator
                    + tile_a * t * itemsize                 # per-tile one-hot
                    + 2 * tile_a * emb_size_atom * 4        # output block
                    + weights_bytes                         # (single-buffered) weights
                    + 4 * tile_a * max(emb_size_edge, emb_size_atom) * 4)  # epilogue tmp
            if need <= budget:
                tile_e = t
                break
    tile_e = _round_up(tile_e, 128)
    n_edges_pad = _round_up(n_edges, tile_e)
    n_edge_tiles = n_edges_pad // tile_e

    # ---- pad edges (zero rows contribute nothing; sentinel idx sorts last) ----
    idx_atom = idx_atom.astype(jnp.int32)
    pad_e = n_edges_pad - n_edges
    if pad_e:
        basis_rad = jnp.pad(basis_rad, ((0, pad_e), (0, 0)))
        m = jnp.pad(m, ((0, pad_e), (0, 0)))
        idx_atom = jnp.pad(idx_atom, (0, pad_e), constant_values=n_atoms_pad - 1)

    # ---- pass 1: per-edge transform (dense_rbf hoisted out of the atom loop) ----
    x_edges = _edge_transform(basis_rad.astype(compute_dtype),
                              m.astype(compute_dtype),
                              w_rbf.astype(compute_dtype),
                              tile_e=tile_e, compute_dtype=compute_dtype,
                              vmem_limit=vmem_limit)

    # ---- sort edges by destination atom so atom slabs see contiguous edge tiles ----
    perm = jnp.argsort(idx_atom)
    idx_s = jnp.take(idx_atom, perm)
    x_s = jnp.take(x_edges, perm, axis=0)

    # ---- flattened (slab, edge-tile) schedule; static length bound ----
    idx_tiles = idx_s.reshape(n_edge_tiles, tile_e)
    lo = (idx_tiles[:, 0] // tile_a).astype(jnp.int32)      # first slab per edge tile
    hi = (idx_tiles[:, -1] // tile_a).astype(jnp.int32)     # last slab per edge tile
    slabs = jnp.arange(n_atom_tiles, dtype=jnp.int32)
    e_start = jnp.searchsorted(hi, slabs, side="left").astype(jnp.int32)
    e_end = (jnp.searchsorted(lo, slabs, side="right") - 1).astype(jnp.int32)
    covered = e_end >= e_start
    cnt = jnp.where(covered, e_end - e_start + 1, 1).astype(jnp.int32)
    off = (jnp.cumsum(cnt) - cnt).astype(jnp.int32)

    n_work = n_edge_tiles + n_atom_tiles - 1                 # static upper bound
    w_ids = jnp.arange(n_work, dtype=jnp.int32)
    marks = jnp.zeros((n_work,), jnp.int32).at[off].add(1)
    slab_of_w = jnp.cumsum(marks).astype(jnp.int32) - 1
    pos = w_ids - off[slab_of_w]
    span = e_end[slab_of_w] - e_start[slab_of_w]
    etile = jnp.clip(e_start[slab_of_w] + pos, 0, n_edge_tiles - 1)
    valid = jnp.logical_and(covered[slab_of_w], pos <= span)
    first = pos == 0
    last = pos == cnt[slab_of_w] - 1
    sched = jnp.stack([slab_of_w, etile,
                       first.astype(jnp.int32),
                       last.astype(jnp.int32),
                       valid.astype(jnp.int32)]).astype(jnp.int32)   # (5, n_work)

    # ---- pass 2 operands / specs ----
    operands = [sched, idx_s.reshape(1, n_edges_pad), x_s]
    in_specs = [
        pl.BlockSpec((1, tile_e), lambda w, s: (0, s[1, w])),
        pl.BlockSpec((tile_e, emb_size_edge), lambda w, s: (s[1, w], 0)),
    ]
    if use_dense1:
        operands.append(w1.astype(compute_dtype))
        in_specs.append(_const_spec((emb_size_edge, emb_size_atom),
                                    lambda w, s: (0, 0)))
    if n_hidden > 0:
        operands.append(w_res.astype(compute_dtype))
        in_specs.append(_const_spec((2 * n_hidden, emb_size_atom, emb_size_atom),
                                    lambda w, s: (0, 0, 0)))

    flops = (2 * n_work * tile_a * tile_e * emb_size_edge
             + n_atom_tiles * tile_a * (
                 (2 * emb_size_edge * emb_size_atom if use_dense1 else 0)
                 + n_hidden * 4 * emb_size_atom * emb_size_atom))
    transcendentals = n_atoms_pad * emb_size_atom * (2 * n_hidden + (1 if use_dense1 else 0))
    bytes_accessed = (n_edges_pad * (emb_size_edge * itemsize + 4)
                      + weights_bytes
                      + n_atoms_pad * emb_size_atom * 4
                      + 5 * n_work * 4)

    grid_spec = pltpu.PrefetchScalarGridSpec(
        num_scalar_prefetch=1,
        grid=(n_work,),
        in_specs=in_specs,
        out_specs=pl.BlockSpec((tile_a, emb_size_atom), lambda w, s: (s[0, w], 0)),
        scratch_shapes=[pltpu.VMEM((tile_a, emb_size_edge), jnp.float32)],
    )

    out = pl.pallas_call(
        _make_scatter_kernel(tile_a, n_hidden, use_dense1, compute_dtype),
        out_shape=jax.ShapeDtypeStruct((n_atoms_pad, emb_size_atom), jnp.float32),
        grid_spec=grid_spec,
        compiler_params=pltpu.CompilerParams(
            dimension_semantics=("arbitrary",),
            vmem_limit_bytes=vmem_limit),
        cost_estimate=pl.CostEstimate(flops=int(flops),
                                      transcendentals=int(transcendentals),
                                      bytes_accessed=int(bytes_accessed)),
    )(*operands)

    return out[:n_atoms]


def atom_update_block_ref(h, m, basis_rad, idx_atom, w_rbf, w1, w_res, n_hidden):
    """Pure-JAX (f32) reference for correctness checking."""
    bases_emb = basis_rad @ w_rbf
    x = m * bases_emb
    x2 = jnp.zeros((h.shape[0], x.shape[1]), x.dtype).at[idx_atom].add(x)
    x2 = x2 * SCALE_SUM
    if w1 is not None:
        x2 = _scaled_silu(x2 @ w1)
    for i in range(n_hidden):
        y = _scaled_silu(_scaled_silu(x2 @ w_res[2 * i]) @ w_res[2 * i + 1])
        x2 = (x2 + y) * INV_SQRT_2
    return x2


if __name__ == "__main__":
    # Small but lane-dense shapes (feature dims multiples of 128, as in real GemNet-OC).
    n_atoms = 64
    n_edges = 500           # deliberately not a tile multiple -> exercises padding
    emb_size_rbf = 128
    emb_size_edge = 256
    emb_size_atom = 128     # != emb_size_edge -> dense1 projection present
    n_hidden = 2

    key = jax.random.PRNGKey(0)
    k = jax.random.split(key, 8)

    h = jax.random.normal(k[0], (n_atoms, emb_size_atom), dtype=jnp.float32)
    m = jax.random.normal(k[1], (n_edges, emb_size_edge), dtype=jnp.float32)
    basis_rad = jax.random.normal(k[2], (n_edges, emb_size_rbf), dtype=jnp.float32)
    idx_atom = jax.random.randint(k[3], (n_edges,), 0, n_atoms, dtype=jnp.int32)

    # Deterministic synthetic bias-free Dense weights, stored transposed for x @ W.
    w_rbf = jax.random.normal(k[4], (emb_size_rbf, emb_size_edge),
                              dtype=jnp.float32) / math.sqrt(emb_size_rbf)
    w1 = jax.random.normal(k[5], (emb_size_edge, emb_size_atom),
                           dtype=jnp.float32) / math.sqrt(emb_size_edge)
    w_res = jax.random.normal(k[6], (2 * n_hidden, emb_size_atom, emb_size_atom),
                              dtype=jnp.float32) / math.sqrt(emb_size_atom)

    ref = atom_update_block_ref(h, m, basis_rad, idx_atom, w_rbf, w1, w_res, n_hidden)

    # f32 MXU path with small explicit tiles: exercises multi-slab / multi-edge-tile
    # scheduling (straddling edge tiles, per-slab epilogues); tight tolerance.
    out_f32 = atom_update_block(h, m, basis_rad, idx_atom, w_rbf, w1, w_res,
                                n_hidden, compute_dtype=jnp.float32,
                                tile_e=128, tile_a=32)
    out_f32 = jax.block_until_ready(out_f32)
    np.testing.assert_allclose(np.asarray(out_f32), np.asarray(ref),
                               atol=2e-3, rtol=2e-3)

    # Default optimized bf16 MXU path with auto tile sizing; looser tolerance
    # (bf16 quantization of activations/weights, ~1% relative).
    out_bf16 = atom_update_block(h, m, basis_rad, idx_atom, w_rbf, w1, w_res, n_hidden)
    out_bf16 = jax.block_until_ready(out_bf16)
    np.testing.assert_allclose(np.asarray(out_bf16), np.asarray(ref),
                               atol=1e-1, rtol=1e-1)

    print("KERNEL_OK")
</pallas_src>

<mosaic_0001>
module attributes {stable_mosaic.version = 11 : i64} {
  func.func @kernel(%arg0: i32, %arg1: memref<128x128xf32, #tpu.memory_space<vmem>>, %arg2: memref<128x256xf32, #tpu.memory_space<vmem>>, %arg3: memref<128x256xf32, #tpu.memory_space<vmem>>, %arg4: memref<128x256xf32, #tpu.memory_space<vmem>>) attributes {dimension_semantics = [#tpu.dimension_semantics<parallel>], iteration_bounds = array<i64: 4>, scalar_prefetch = 0 : i64, scratch_operands = 0 : i64, tpu.core_type = #tpu.core_type<tc>, window_params = [{transform_indices = @transform_0, window_bounds = array<i64: 128, 128>}, {transform_indices = @transform_1, window_bounds = array<i64: 128, 256>}, {pipeline_mode = #tpu.pipeline_mode<synchronous>, transform_indices = @transform_2, window_bounds = array<i64: 128, 256>}, {transform_indices = @transform_3, window_bounds = array<i64: 128, 256>}]} {
    %c0 = arith.constant 0 : index
    %c0_0 = arith.constant 0 : index
    %0 = vector.load %arg1[%c0, %c0_0] : memref<128x128xf32, #tpu.memory_space<vmem>>, vector<128x128xf32>
    %c0_1 = arith.constant 0 : index
    %c0_2 = arith.constant 0 : index
    %1 = vector.load %arg3[%c0_1, %c0_2] : memref<128x256xf32, #tpu.memory_space<vmem>>, vector<128x256xf32>
    %cst = arith.constant dense<0.000000e+00> : vector<128x256xf32>
    %2 = tpu.matmul %0, %1, %cst {dimension_numbers = #tpu.dot_dimension_numbers<[1], [0], [0], [1], [0, 0, 1, 1], [], []>} : vector<128x128xf32>, vector<128x256xf32>, vector<128x256xf32> -> vector<128x256xf32>
    %c0_3 = arith.constant 0 : index
    %c0_4 = arith.constant 0 : index
    %3 = vector.load %arg2[%c0_3, %c0_4] : memref<128x256xf32, #tpu.memory_space<vmem>>, vector<128x256xf32>
    %4 = arith.mulf %3, %2 : vector<128x256xf32>
    %c0_5 = arith.constant 0 : index
    %c0_6 = arith.constant 0 : index
    %5 = vector.load %arg4[%c0_5, %c0_6] : memref<128x256xf32, #tpu.memory_space<vmem>>, vector<128x256xf32>
    tpu.vector_store %arg4[%c0_5, %c0_6], %4 {strides = array<i32>} : memref<128x256xf32, #tpu.memory_space<vmem>>, vector<128x256xf32>,
    return
  }
  func.func @transform_0(%arg0: i32) -> (i32, i32) {
    %c0_i32 = arith.constant 0 : i32
    %c0_i32_0 = arith.constant 0 : i32
    return %arg0, %c0_i32 : i32, i32
  }
  func.func @transform_1(%arg0: i32) -> (i32, i32) {
    %c0_i32 = arith.constant 0 : i32
    %c0_i32_0 = arith.constant 0 : i32
    return %arg0, %c0_i32 : i32, i32
  }
  func.func @transform_2(%arg0: i32) -> (i32, i32) {
    %c0_i32 = arith.constant 0 : i32
    %c0_i32_0 = arith.constant 0 : i32
    %c0_i32_1 = arith.constant 0 : i32
    return %c0_i32, %c0_i32_0 : i32, i32
  }
  func.func @transform_3(%arg0: i32) -> (i32, i32) {
    %c0_i32 = arith.constant 0 : i32
    %c0_i32_0 = arith.constant 0 : i32
    return %arg0, %c0_i32 : i32, i32
  }
}

</mosaic_0001>

<bundles_post_ra>
// kernel: tpu_custom_call.1
= control target key start
LH: loop header
LB: loop body
LE: loop exit
PB: predicated region body
PF: predicated region fallthrough
CT: control target
= control target key end

     0   :  { %s1361_s0 = inlined_call_operand.hbm [shape: f32[512,128], index: 0, kind: input, shape index: {}]   ;;  %s1362_s1 = inlined_call_operand.hbm [shape: f32[512,256], index: 1, kind: input, shape index: {}]   ;;  %s1363_s2 = inlined_call_operand.hbm [shape: f32[128,256], index: 2, kind: input, shape index: {}]   ;;  %s1364_s3 = inlined_call_operand.hbm [shape: f32[512,256], index: 3, kind: output, shape index: {}]  }
   0x1   :  { %1370 = sst [smem:[#allocation13_spill]] %s1361_s0 }
   0x2   :  { %8 = vsyncpa [#allocation3], 0 }
   0x3   :  { %10 = vsyncpa [#allocation3 + $0x1], 0 }
   0x4   :  { %11 = vsyncpa [#allocation6], 0 }
   0x5   :  { %13 = vsyncpa [#allocation6 + $0x1], 0 }
   0x6   :  { %14 = vsyncpa [#allocation4], 0 }
   0x7   :  { %16 = vsyncpa [#allocation4 + $0x1], 0  ;;  %s1011_s12 = smov 0   ;;  %s1013_s13 = smov 0  }
   0x8   :  { %s1015_s14 = smov 0   ;;  %s1017_s15 = smov 0  }
   0x9 LB: > { %s1032_s16 = sadd.s32 4294967295, %s978_s15   ;;  %s672_s17 = sadd.s32 4294967294, %s978_s15   ;;  %s978_s15 = sphi %s1017_s15, %s1389_s15   ;;  %s974_s14 = sphi %s1015_s14, %s1388_s14   ;;  %s970_s13 = sphi %s1013_s13, %s1387_s13   ;;  %s966_s12 = sphi %s1011_s12, %s1386_s12  }
   0xa   : > { %p42_p0 = scmp.ne.s32.totalorder %s970_s13, %s966_s12  ;;  %p1365_p1 = scmp.eq.s32.totalorder %s1032_s16, 0 }
   0xb   : > { %p119_p3 = scmp.eq.s32.totalorder %s672_s17, 3  ;;  %p673_p5 = scmp.ge.s32.totalorder %s978_s15, 1 }
   0xc   : > { %p1041_p4 = por %p1365_p1, %p42_p0  ;;  %p126_p7 = scmp.lt.s32.totalorder %s978_s15, 5 }
   0xd   : > { %p1046_p6 = por %p119_p3, %p42_p0  ;;  %s980_s21 = smov [#allocation7]  }
   0xe   : > { %s1371_s18 = scalar_select %p1041_p4, 1, 0 }
   0xf   : > { %s1372_s19 = scalar_select %p1046_p6, 1, 0 }
  0x10   : > { %p1051_p8 = pnand %p673_p5, %p126_p7  ;;  %s138_s22 = sshll.u32 %s980_s21, 4  ;;  %s139_s22 = int_to_ptr.vmem [resolvable:$true] %s138_s22 }
  0x11   : > { %s1064_s24 = sadd.s32 1, %s978_s15   ;;  %s29_s25 = sadd.s32 1, %s974_s14 }
  0x12   : > { %s1373_s20 = scalar_select %p1051_p8, 1, 0 }
  0x13   : > { %p757_p9 = pneg %p1051_p8  ;;  %s26_s26 = ssub.s32 %s978_s15, %s1064_s24 }
  0x14   : > { %s816_s29 = scalar_lea.hbm %s1363_s2, 4096 }
  0x15   : > { %p1059_p10 = pnand %p757_p9, %p1365_p1  ;;  %p817_p11 = scmp.ne.s32.totalorder %s1363_s2, %s816_s29 }
  0x16   : > { %p823_p3 = scmp.lt.u32.totalorder %s816_s29, %s1363_s2 }
  0x17   : > { %p818_p12 = pneg %p1059_p10 }
  0x19   : > { %p819_p13 = pnand %p818_p12, %p817_p11 }
  0x1b   : > { %p820_p0 = pneg %p819_p13 }
  0x1d   : > { %p825_p5 = pnand %p823_p3, %p820_p0 }
  0x1f   : > { %828 = shalt.err (!%p825_p5)
}
  0x20   : > { %s829_s7 = scalar_lea.vmem %s139_s22, 4096  ;;  %p837_p2 = scmp.lt.s32.totalorder %s139_s22, %s139_s22 }
  0x21   : > { %p830_p7 = scmp.ne.s32.totalorder %s139_s22, %s829_s7  ;;  %p838_p6 = scmp.lt.s32.totalorder %s829_s7, %s829_s7 }
  0x23   : > { %p832_p9 = pnand %p830_p7, %p818_p12  ;;  %p839_p4 = por %p838_p6, %p837_p2 }
  0x25   : > { %p833_p1 = pneg %p832_p9 }
  0x27   : > { %p840_p8 = pnand %p839_p4, %p833_p1 }
  0x29   : > { %843 = shalt.err (!%p840_p8)
}
  0x2a   : > { %s1368_s8 = smov 256   ;;  %s1369_s9 = smov 16  }
  0x2b   : > { %760 = dma.hbm_to_vmem [thread:$0]  (!%p1059_p10), %s1363_s2, 4096, %s139_s22, [#allocation6], %s1368_s8, %s1368_s8, %s1369_s9  }
  0x2c   : > { %p27_p1 = scmp.eq.s32.totalorder %s26_s26, 0  ;;  %p36_p2 = scmp.ne.s32.totalorder %s974_s14, %s970_s13 }
  0x2d   : > { %p37_p4 = scmp.eq.s32.totalorder %s978_s15, 0  ;;  %p773_p6 = scmp.lt.s32.totalorder %s978_s15, 4 }
  0x2e   : > { %s1093_s17 = scalar_select %p27_p1, %s974_s14, %s29_s25  }
  0x2f   : > { %p38_p8 = por %p37_p4, %p36_p2  ;;  %p1375_p11 = scmp.eq.s32.totalorder %s1032_s16, 3 }
  0x30   : > { %s1102_s23 = sand.u32 1, %s974_s14   ;;  %s694_s27 = sshll.u32 %s978_s15, 11 }
  0x31   : > { %p1097_p12 = por %p1375_p11, %p36_p2  ;;  %s676_s28 = sshll.u32 %s1102_s23, 7 }
  0x32   : > { %s1377_s0 = sld [smem:[#allocation13_spill]]  ;;  %s156_s25 = scalar_lea.vmem [#allocation2], %s676_s28 }
  0x33   : > { %s163_s30 = sshll.u32 %s156_s25, 4  ;;  %p1111_p10 = pnand %p773_p6, %p38_p8  ;;  %s1115_s30 = int_to_ptr.vmem [resolvable:$true] %s163_s30 }
  0x34   : > { %s153_s5 = scalar_lea.sflag [#allocation3], %s1102_s23 }
  0x35   : > { %p846_p0 = pneg %p1111_p10 }
  0x38   : > { %s1109_s26 = scalar_lea.hbm %s1377_s0, %s694_s27  ;;  %s849_s11 = scalar_lea.hbm %s1377_s0, 8192 }
  0x39   : > { %s844_s6 = scalar_lea.hbm %s1109_s26, 2048  ;;  %p850_p7 = scmp.lt.u32.totalorder %s1109_s26, %s1377_s0 }
  0x3a   : > { %p845_p13 = scmp.ne.s32.totalorder %s1109_s26, %s844_s6  ;;  %p851_p9 = scmp.lt.u32.totalorder %s849_s11, %s844_s6 }
  0x3b   : > { %p853_p2 = scmp.lt.u32.totalorder %s844_s6, %s1109_s26 }
  0x3c   : > { %p847_p3 = pnand %p846_p0, %p845_p13  ;;  %p852_p1 = por %p851_p9, %p850_p7 }
  0x3e   : > { %p848_p5 = pneg %p847_p3  ;;  %p854_p4 = por %p853_p2, %p852_p1 }
  0x40   : > { %p855_p6 = pnand %p854_p4, %p848_p5 }
  0x42   : > { %858 = shalt.err (!%p855_p6)
}
  0x43   : > { %s859_s29 = scalar_lea.vmem %s1115_s30, 2048  ;;  %s983_s22 = smov [#allocation2]  }
  0x44   : > { %p860_p8 = scmp.ne.s32.totalorder %s1115_s30, %s859_s29  ;;  %s864_s25 = sshll.u32 %s983_s22, 4  ;;  %s865_s25 = int_to_ptr.vmem [resolvable:$false] %s864_s25 }
  0x45   : > { %s866_s7 = scalar_lea.vmem %s865_s25, 4096  ;;  %p867_p3 = scmp.lt.s32.totalorder %s1115_s30, %s865_s25 }
  0x46   : > { %p862_p11 = pnand %p860_p8, %p846_p0  ;;  %p868_p7 = scmp.lt.s32.totalorder %s866_s7, %s859_s29 }
  0x48   : > { %p863_p13 = pneg %p862_p11  ;;  %p869_p9 = por %p868_p7, %p867_p3 }
  0x4a   : > { %p870_p1 = pnand %p869_p9, %p863_p13 }
  0x4c   : > { %873 = shalt.err (!%p870_p1)
}
  0x4d   : > { %s984_s6 = smov 128   ;;  %s985_s10 = smov 8  }
  0x4e   : > { %764 = dma.hbm_to_vmem [thread:$0]  (!%p1111_p10), %s1109_s26, 2048, %s1115_s30, %s153_s5, %s984_s6, %s984_s6, %s985_s10  }
  0x4f   : > { %s173_s11 = sand.u32 1, %s978_s15   ;;  %s679_s27 = sshll.u32 %s1102_s23, 8 }
  0x50   : > { %s696_s28 = sshll.u32 %s978_s15, 12  ;;  %s177_s29 = scalar_lea.vmem [#allocation5], %s679_s27 }
  0x51   : > { %s185_s22 = sshll.u32 %s177_s29, 4  ;;  %s1151_s8 = scalar_lea.hbm %s1362_s1, %s696_s28  ;;  %s1153_s22 = int_to_ptr.vmem [resolvable:$true] %s185_s22 }
  0x52   : > { %s1155_s9 = scalar_lea.sflag [#allocation6], %s173_s11  ;;  %s874_s0 = scalar_lea.hbm %s1151_s8, 4096 }
  0x53   : > { %p875_p5 = scmp.ne.s32.totalorder %s1151_s8, %s874_s0  ;;  %s879_s30 = scalar_lea.hbm %s1362_s1, 16384 }
  0x54   : > { %p880_p6 = scmp.lt.u32.totalorder %s1151_s8, %s1362_s1  ;;  %p881_p8 = scmp.lt.u32.totalorder %s879_s30, %s874_s0 }
  0x55   : > { %p877_p2 = pnand %p875_p5, %p846_p0  ;;  %p883_p13 = scmp.lt.u32.totalorder %s874_s0, %s1151_s8 }
  0x56   : > { %p882_p11 = por %p881_p8, %p880_p6 }
  0x57   : > { %p878_p4 = pneg %p877_p2 }
  0x58   : > { %p884_p3 = por %p883_p13, %p882_p11 }
  0x5a   : > { %p885_p7 = pnand %p884_p3, %p878_p4 }
  0x5c   : > { %888 = shalt.err (!%p885_p7)
}
  0x5d   : > { %s889_s10 = scalar_lea.vmem %s1153_s22, 4096  ;;  %s986_s11 = smov [#allocation5]  }
  0x5e   : > { %p890_p9 = scmp.ne.s32.totalorder %s1153_s22, %s889_s10  ;;  %s894_s27 = sshll.u32 %s986_s11, 4  ;;  %s895_s27 = int_to_ptr.vmem [resolvable:$false] %s894_s27 }
  0x5f   : > { %s896_s28 = scalar_lea.vmem %s895_s27, 8192  ;;  %p897_p2 = scmp.lt.s32.totalorder %s1153_s22, %s895_s27 }
  0x60   : > { %p892_p1 = pnand %p890_p9, %p846_p0  ;;  %p898_p6 = scmp.lt.s32.totalorder %s896_s28, %s889_s10 }
  0x62   : > { %p893_p5 = pneg %p892_p1  ;;  %p899_p8 = por %p898_p6, %p897_p2 }
  0x64   : > { %p900_p11 = pnand %p899_p8, %p893_p5 }
  0x66   : > { %903 = shalt.err (!%p900_p11)
}
  0x67   : > { %s1379_s0 = smov 16   ;;  %s1380_s29 = smov 256  }
  0x68   : > { %767 = dma.hbm_to_vmem [thread:$0]  (!%p1111_p10), %s1151_s8, 4096, %s1153_s22, %s1155_s9, %s1380_s29, %s1380_s29, %s1379_s0  }
  0x69   : > { %p1381_p0 = scmp.ne.s32.totalorder %s1373_s20, 0 }
  0x6a   : > { %s1187_s25 = sand.u32 (!%p1381_p0), 1, %s970_s13   ;;  %p1382_p4 = scmp.ne.s32.totalorder (!%p1381_p0), %s1371_s18, 0 }
  0x6b   : > { %197 = sbr.rel (%p1381_p0) target bundleno = 414 (0x19e), region = 32  ;;  %s684_s7 = sshll.u32 (!%p1381_p0), %s1187_s25, 7 }
  0x6c   : > { %s200_s23 = scalar_lea.sflag (!%p1381_p0), [#allocation3], %s1187_s25  ;;  %s1191_s26 = scalar_lea.vmem (!%p1381_p0), [#allocation2], %s684_s7 }
  0x72   : > { %949 = dma.done.wait (%p1382_p4), %s200_s23, 2048  }
  0x73   : > { %951 = vsyncadd (%p1382_p4), %s200_s23, 4294965248  ;;  %s208_s20 = sand.u32 1, %s1032_s16   ;;  %s685_s8 = sshll.u32 %s1187_s25, 8 }
  0x74   : > { %s209_s9 = scalar_lea.sflag [#allocation6], %s208_s20  ;;  %s1201_s4 = scalar_lea.vmem [#allocation5], %s685_s8 }
  0x75   : > { %953 = dma.done.wait (%p1382_p4), %s209_s9, 4096  }
  0x76   : > { %955 = vsyncadd (%p1382_p4), %s209_s9, 4294963200  ;;  %p1383_p10 = scmp.eq.s32.totalorder %s1032_s16, 0 }
  0x78   : > { %957 = dma.done.wait (%p1383_p10), [#allocation6], 4096   ;;  %p1384_p13 = pmov %p1383_p10 }
  0x79   : > { %v987_v0 = vmov 0.0   ;;  %v264_v1 = vld [vmem:[#allocation7 + $0x8] sm:$0xff]  ;;  %v266_v2 = vld [vmem:[#allocation7 + $0x18] sm:$0xff]  ;;  %v263_v3 = vld [vmem:[#allocation7] sm:$0xff]  ;;  %s1251_s18 = scalar_lea.vmem [#allocation8], %s685_s8  ;;  %s698_s22 = sshll.u32 %s1032_s16, 12 }
  0x7a   : > { %959 = vsyncadd (%p1384_p13), [#allocation6], 4294963200  ;;  %359 = vmatprep.mubr.f32.mxu0 %v987_v0  ;;  %407 = vmatprep.mubr.f32.mxu1 %v987_v0  ;;  %v699_v4 = vpack.c.bf16 %v266_v2, %v264_v1  ;;  %v265_v5 = vld [vmem:[#allocation7 + $0x10] sm:$0xff]  ;;  %v268_v6 = vld [vmem:[#allocation7 + $0x28] sm:$0xff]  ;;  %s567_s30 = sshll.u32 %s1251_s18, 4  ;;  %s1312_s6 = scalar_lea.hbm %s1364_s3, %s698_s22  ;;  %s1314_s30 = int_to_ptr.vmem [resolvable:$true] %s567_s30 }
  0x7b   : > { %v270_v7 = vld [vmem:[#allocation7 + $0x38] sm:$0xff]  ;;  %v701_v8 = vpack.c.bf16 %v265_v5, %v263_v3  ;;  %v267_v10 = vld [vmem:[#allocation7 + $0x20] sm:$0xff]  ;;  %v269_v11 = vld [vmem:[#allocation7 + $0x30] sm:$0xff]  ;;  %s553_s10 = scalar_lea.sflag [#allocation4], %s1187_s25  ;;  %s904_s11 = scalar_lea.vmem %s1314_s30, 4096 }
  0x7c   : > { %v703_v9 = vpack.c.bf16 %v270_v7, %v268_v6  ;;  %v272_v12 = vld [vmem:[#allocation7 + $0x48] sm:$0xff]  ;;  %700 = vmatprep.subr.bf16.mxu0 %v699_v4  ;;  %731 = vmatprep.subr.bf16.mxu1 %v699_v4  ;;  %v274_v13 = vld [vmem:[#allocation7 + $0x58] sm:$0xff]  ;;  %v705_v14 = vpack.c.bf16 %v269_v11, %v267_v10  ;;  %v271_v16 = vld [vmem:[#allocation7 + $0x40] sm:$0xff]  ;;  %p905_p3 = scmp.ne.s32.totalorder %s1314_s30, %s904_s11  ;;  %s988_s27 = smov [#allocation8]  }
  0x7d   : > { %702 = vmatpush1.bf16.msra.mxu0 %v701_v8  ;;  %739 = vmatpush1.bf16.msra.mxu1 %v701_v8  ;;  %v707_v15 = vpack.c.bf16 %v274_v13, %v272_v12  ;;  %v273_v17 = vld [vmem:[#allocation7 + $0x50] sm:$0xff]  ;;  %v276_v18 = vld [vmem:[#allocation7 + $0x68] sm:$0xff]  ;;  %v278_v19 = vld [vmem:[#allocation7 + $0x78] sm:$0xff]  ;;  %s908_s28 = sshll.u32 %s988_s27, 4  ;;  %s909_s28 = int_to_ptr.vmem [resolvable:$false] %s908_s28 }
  0x7e   : > { %704 = vmatprep.subr.bf16.mxu0 %v703_v9  ;;  %732 = vmatprep.subr.bf16.mxu1 %v703_v9  ;;  %v709_v20 = vpack.c.bf16 %v273_v17, %v271_v16  ;;  %v711_v21 = vpack.c.bf16 %v278_v19, %v276_v18  ;;  %v275_v22 = vld [vmem:[#allocation7 + $0x60] sm:$0xff]  ;;  %v277_v23 = vld [vmem:[#allocation7 + $0x70] sm:$0xff]  ;;  %v280_v24 = vld [vmem:[#allocation7 + $0x88] sm:$0xff]  ;;  %p906_p7 = pnand %p905_p3, %p1097_p12  ;;  %s910_s0 = scalar_lea.vmem %s909_s28, 8192 }
  0x7f   : > { %v282_v25 = vld [vmem:[#allocation7 + $0x98] sm:$0xff]  ;;  %v713_v26 = vpack.c.bf16 %v277_v23, %v275_v22  ;;  %v279_v28 = vld [vmem:[#allocation7 + $0x80] sm:$0xff]  ;;  %v281_v29 = vld [vmem:[#allocation7 + $0x90] sm:$0xff]  ;;  %p911_p1 = scmp.lt.s32.totalorder %s1314_s30, %s909_s28  ;;  %p912_p5 = scmp.lt.s32.totalorder %s910_s0, %s904_s11 }
  0x80   : > { %v715_v27 = vpack.c.bf16 %v282_v25, %v280_v24  ;;  %v284_v30 = vld [vmem:[#allocation7 + $0xa8] sm:$0xff]  ;;  %v286_v31 = vld [vmem:[#allocation7 + $0xb8] sm:$0xff]  ;;  %v717_v32 = vpack.c.bf16 %v281_v29, %v279_v28  ;;  %v283_v34 = vld [vmem:[#allocation7 + $0xa0] sm:$0xff]  ;;  %p907_p9 = pneg %p906_p7 }
  0x81   : > { %706 = vmatpush1.bf16.msra.mxu0 %v705_v14  ;;  %740 = vmatpush1.bf16.msra.mxu1 %v705_v14  ;;  %v719_v33 = vpack.c.bf16 %v286_v31, %v284_v30  ;;  %v285_v35 = vld [vmem:[#allocation7 + $0xb0] sm:$0xff]  ;;  %v288_v36 = vld [vmem:[#allocation7 + $0xc8] sm:$0xff]  ;;  %v290_v37 = vld [vmem:[#allocation7 + $0xd8] sm:$0xff]  ;;  %p913_p2 = por %p912_p5, %p911_p1 }
  0x82   : > { %708 = vmatprep.subr.bf16.mxu0 %v707_v15  ;;  %733 = vmatprep.subr.bf16.mxu1 %v707_v15  ;;  %v721_v38 = vpack.c.bf16 %v285_v35, %v283_v34  ;;  %v723_v39 = vpack.c.bf16 %v290_v37, %v288_v36  ;;  %v287_v40 = vld [vmem:[#allocation7 + $0xc0] sm:$0xff]  ;;  %v289_v41 = vld [vmem:[#allocation7 + $0xd0] sm:$0xff]  ;;  %v292_v42 = vld [vmem:[#allocation7 + $0xe8] sm:$0xff] }
  0x83   : > { %v294_v43 = vld [vmem:[#allocation7 + $0xf8] sm:$0xff]  ;;  %v725_v44 = vpack.c.bf16 %v289_v41, %v287_v40  ;;  %v291_v46 = vld [vmem:[#allocation7 + $0xe0] sm:$0xff]  ;;  %v293_v47 = vld [vmem:[#allocation7 + $0xf0] sm:$0xff]  ;;  %p914_p6 = pnand %p913_p2, %p907_p9 }
  0x84   : > { %v727_v45 = vpack.c.bf16 %v294_v43, %v292_v42  ;;  %v729_v48 = vpack.c.bf16 %v293_v47, %v291_v46  ;;  %v247_v49 = vld [vmem:[%s1191_s26] sm:$0xff]  ;;  %v248_v51 = vld [vmem:[%s1191_s26 + $0x8] sm:$0xff]  ;;  %v249_v53 = vld [vmem:[%s1191_s26 + $0x10] sm:$0xff] }
  0x85   : > { %710 = vmatpush1.bf16.msra.mxu0 %v709_v20  ;;  %741 = vmatpush1.bf16.msra.mxu1 %v709_v20  ;;  %v255_v50 = vld [vmem:[%s1191_s26 + $0x40] sm:$0xff]  ;;  %v256_v52 = vld [vmem:[%s1191_s26 + $0x48] sm:$0xff]  ;;  %v257_v54 = vld [vmem:[%s1191_s26 + $0x50] sm:$0xff] }
  0x86   : > { %712 = vmatprep.subr.bf16.mxu0 %v711_v21  ;;  %734 = vmatprep.subr.bf16.mxu1 %v711_v21  ;;  %v250_v55 = vld [vmem:[%s1191_s26 + $0x18] sm:$0xff]  ;;  %v251_v57 = vld [vmem:[%s1191_s26 + $0x20] sm:$0xff]  ;;  %v252_v59 = vld [vmem:[%s1191_s26 + $0x28] sm:$0xff] }
  0x87   : > { %v258_v56 = vld [vmem:[%s1191_s26 + $0x58] sm:$0xff]  ;;  %v259_v58 = vld [vmem:[%s1191_s26 + $0x60] sm:$0xff]  ;;  %v260_v60 = vld [vmem:[%s1191_s26 + $0x68] sm:$0xff] }
  0x88   : > { %v253_v61 = vld [vmem:[%s1191_s26 + $0x30] sm:$0xff]  ;;  %v254_v63 = vld [vmem:[%s1191_s26 + $0x38] sm:$0xff]  ;;  %v456_v2 = vld [vmem:[%s1201_s4] sm:$0xff] }
  0x89   : > { %714 = vmatpush1.bf16.msra.mxu0 %v713_v26  ;;  %742 = vmatpush1.bf16.msra.mxu1 %v713_v26  ;;  %v261_v62 = vld [vmem:[%s1191_s26 + $0x70] sm:$0xff]  ;;  %v262_v1 = vld [vmem:[%s1191_s26 + $0x78] sm:$0xff]  ;;  %v472_v3 = vld [vmem:[%s1201_s4 + $0x80] sm:$0xff] }
  0x8a   : > { %716 = vmatprep.subr.bf16.mxu0 %v715_v27  ;;  %735 = vmatprep.subr.bf16.mxu1 %v715_v27  ;;  %v457_v4 = vld [vmem:[%s1201_s4 + $0x8] sm:$0xff]  ;;  %v458_v13 = vld [vmem:[%s1201_s4 + $0x10] sm:$0xff]  ;;  %v459_v15 = vld [vmem:[%s1201_s4 + $0x18] sm:$0xff] }
  0x8b   : > { %v473_v5 = vld [vmem:[%s1201_s4 + $0x88] sm:$0xff]  ;;  %v474_v14 = vld [vmem:[%s1201_s4 + $0x90] sm:$0xff]  ;;  %v475_v16 = vld [vmem:[%s1201_s4 + $0x98] sm:$0xff] }
  0x8c   : > { %v460_v25 = vld [vmem:[%s1201_s4 + $0x20] sm:$0xff]  ;;  %v461_v27 = vld [vmem:[%s1201_s4 + $0x28] sm:$0xff]  ;;  %v462_v37 = vld [vmem:[%s1201_s4 + $0x30] sm:$0xff] }
  0x8d   : > { %718 = vmatpush1.bf16.msra.mxu0 %v717_v32  ;;  %743 = vmatpush1.bf16.msra.mxu1 %v717_v32  ;;  %v476_v26 = vld [vmem:[%s1201_s4 + $0xa0] sm:$0xff]  ;;  %v477_v28 = vld [vmem:[%s1201_s4 + $0xa8] sm:$0xff]  ;;  %v479_v40 = vld [vmem:[%s1201_s4 + $0xb8] sm:$0xff] }
  0x8e   : > { %720 = vmatprep.subr.bf16.mxu0 %v719_v33  ;;  %736 = vmatprep.subr.bf16.mxu1 %v719_v33 }
  0x91   : > { %722 = vmatpush1.bf16.msra.mxu0 %v721_v38  ;;  %744 = vmatpush1.bf16.msra.mxu1 %v721_v38  ;;  %v478_v38 = vld [vmem:[%s1201_s4 + $0xb0] sm:$0xff] }
  0x92   : > { %724 = vmatprep.subr.bf16.mxu0 %v723_v39  ;;  %737 = vmatprep.subr.bf16.mxu1 %v723_v39  ;;  %v463_v39 = vld [vmem:[%s1201_s4 + $0x38] sm:$0xff] }
  0x95   : > { %726 = vmatpush1.bf16.msra.mxu0 %v725_v44  ;;  %745 = vmatpush1.bf16.msra.mxu1 %v725_v44 }
  0x96   : > { %728 = vmatprep.subr.bf16.mxu0 %v727_v45  ;;  %738 = vmatprep.subr.bf16.mxu1 %v727_v45 }
  0x99   : > { %730 = vmatpush1.bf16.msra.mxu0 %v729_v48  ;;  %746 = vmatpush1.bf16.msra.mxu1 %v729_v48 }
  0x9c   : > { %360 = vmatmul.mubr.f32.vlgmr.msra.gmra.mrb[0].mxu0 %v247_v49  ;;  %408 = vmatmul.mubr.f32.vlgmr.msra.gmra.mrb[0].mxu1 %v255_v50  ;;  %v464_v49 = vld [vmem:[%s1201_s4 + $0x40] sm:$0xff] }
  0x9d   : > { %365 = vmatprep.mubr.f32.mxu0 %v987_v0  ;;  %413 = vmatprep.mubr.f32.mxu1 %v987_v0  ;;  %v480_v50 = vld [vmem:[%s1201_s4 + $0xc0] sm:$0xff] }
  0xa0   : > { %366 = vmatmul.mubr.f32.gmra.mrb[2].mxu0 %v248_v51  ;;  %414 = vmatmul.mubr.f32.gmra.mrb[2].mxu1 %v256_v52  ;;  %v465_v51 = vld [vmem:[%s1201_s4 + $0x48] sm:$0xff] }
  0xa1   : > { %371 = vmatprep.mubr.f32.mxu0 %v987_v0  ;;  %419 = vmatprep.mubr.f32.mxu1 %v987_v0  ;;  %v481_v52 = vld [vmem:[%s1201_s4 + $0xc8] sm:$0xff] }
  0xa4   : > { %372 = vmatmul.mubr.f32.gmra.mrb[4].mxu0 %v249_v53  ;;  %420 = vmatmul.mubr.f32.gmra.mrb[4].mxu1 %v257_v54 }
  0xa5   : > { %377 = vmatprep.mubr.f32.mxu0 %v987_v0  ;;  %425 = vmatprep.mubr.f32.mxu1 %v987_v0 }
  0xa8   : > { %378 = vmatmul.mubr.f32.gmra.mrb[6].mxu0 %v250_v55  ;;  %426 = vmatmul.mubr.f32.gmra.mrb[6].mxu1 %v258_v56 }
  0xa9   : > { %383 = vmatprep.mubr.f32.mxu0 %v987_v0  ;;  %431 = vmatprep.mubr.f32.mxu1 %v987_v0 }
  0xac   : > { %384 = vmatmul.mubr.f32.gmra.mrb[8].mxu0 %v251_v57  ;;  %432 = vmatmul.mubr.f32.gmra.mrb[8].mxu1 %v259_v58 }
  0xad   : > { %389 = vmatprep.mubr.f32.mxu0 %v987_v0  ;;  %437 = vmatprep.mubr.f32.mxu1 %v987_v0 }
  0xb0   : > { %390 = vmatmul.mubr.f32.gmra.mrb[10].mxu0 %v252_v59  ;;  %438 = vmatmul.mubr.f32.gmra.mrb[10].mxu1 %v260_v60 }
  0xb1   : > { %395 = vmatprep.mubr.f32.mxu0 %v987_v0  ;;  %443 = vmatprep.mubr.f32.mxu1 %v987_v0 }
  0xb4   : > { %396 = vmatmul.mubr.f32.gmra.mrb[12].mxu0 %v253_v61  ;;  %444 = vmatmul.mubr.f32.gmra.mrb[12].mxu1 %v261_v62  ;;  %v466_v61 = vld [vmem:[%s1201_s4 + $0x50] sm:$0xff] }
  0xb5   : > { %401 = vmatprep.mubr.f32.mxu0 %v987_v0  ;;  %449 = vmatprep.mubr.f32.mxu1 %v987_v0  ;;  %v482_v62 = vld [vmem:[%s1201_s4 + $0xd0] sm:$0xff] }
  0xb8   : > { %402 = vmatmul.mubr.f32.gmra.mrb[14].mxu0 %v254_v63  ;;  %450 = vmatmul.mubr.f32.gmra.mrb[14].mxu1 %v262_v1  ;;  %v467_v63 = vld [vmem:[%s1201_s4 + $0x58] sm:$0xff] }
  0xb9   : > { %v483_v1 = vld [vmem:[%s1201_s4 + $0xd8] sm:$0xff] }
 0x16f   : > { %v361_v6 = vpop.f32.mrb[0].mxu0  ;;  %v409_v7 = vpop.f32.mrb[0].mxu1 }
 0x170   : > { %v488_v8 = vmul.f32 %v456_v2, %v361_v6  ;;  %v504_v9 = vmul.f32 %v472_v3, %v409_v7  ;;  %v363_v10 = vpop.f32.mrb[1].mxu0  ;;  %v411_v11 = vpop.f32.mrb[1].mxu1 }
 0x171   : > { %v489_v0 = vmul.f32 %v457_v4, %v363_v10  ;;  %v505_v12 = vmul.f32 %v473_v5, %v411_v11  ;;  %v468_v10 = vld [vmem:[%s1201_s4 + $0x60] sm:$0xff] }
 0x172   : > { %520 = vst [vmem:[%s1251_s18] sm:$0xff] %v488_v8  ;;  %536 = vst [vmem:[%s1251_s18 + $0x80] sm:$0xff] %v504_v9  ;;  %v484_v11 = vld [vmem:[%s1201_s4 + $0xe0] sm:$0xff] }
 0x173   : > { %521 = vst [vmem:[%s1251_s18 + $0x8] sm:$0xff] %v489_v0  ;;  %537 = vst [vmem:[%s1251_s18 + $0x88] sm:$0xff] %v505_v12  ;;  %v367_v17 = vpop.f32.mrb[2].mxu0  ;;  %v415_v18 = vpop.f32.mrb[2].mxu1  ;;  %v469_v0 = vld [vmem:[%s1201_s4 + $0x68] sm:$0xff] }
 0x174   : > { %v490_v19 = vmul.f32 %v458_v13, %v367_v17  ;;  %v506_v20 = vmul.f32 %v474_v14, %v415_v18  ;;  %v369_v21 = vpop.f32.mrb[3].mxu0  ;;  %v417_v22 = vpop.f32.mrb[3].mxu1  ;;  %v485_v12 = vld [vmem:[%s1201_s4 + $0xe8] sm:$0xff] }
 0x175   : > { %v491_v23 = vmul.f32 %v459_v15, %v369_v21  ;;  %v507_v24 = vmul.f32 %v475_v16, %v417_v22  ;;  %v470_v21 = vld [vmem:[%s1201_s4 + $0x70] sm:$0xff] }
 0x176   : > { %522 = vst [vmem:[%s1251_s18 + $0x10] sm:$0xff] %v490_v19  ;;  %538 = vst [vmem:[%s1251_s18 + $0x90] sm:$0xff] %v506_v20  ;;  %v486_v22 = vld [vmem:[%s1201_s4 + $0xf0] sm:$0xff] }
 0x177   : > { %523 = vst [vmem:[%s1251_s18 + $0x18] sm:$0xff] %v491_v23  ;;  %539 = vst [vmem:[%s1251_s18 + $0x98] sm:$0xff] %v507_v24  ;;  %v373_v29 = vpop.f32.mrb[4].mxu0  ;;  %v421_v30 = vpop.f32.mrb[4].mxu1  ;;  %v471_v23 = vld [vmem:[%s1201_s4 + $0x78] sm:$0xff] }
 0x178   : > { %v492_v31 = vmul.f32 %v460_v25, %v373_v29  ;;  %v508_v32 = vmul.f32 %v476_v26, %v421_v30  ;;  %v375_v33 = vpop.f32.mrb[5].mxu0  ;;  %v423_v34 = vpop.f32.mrb[5].mxu1  ;;  %v487_v24 = vld [vmem:[%s1201_s4 + $0xf8] sm:$0xff] }
 0x179   : > { %v493_v35 = vmul.f32 %v461_v27, %v375_v33  ;;  %v509_v36 = vmul.f32 %v477_v28, %v423_v34 }
 0x17a   : > { %524 = vst [vmem:[%s1251_s18 + $0x20] sm:$0xff] %v492_v31  ;;  %540 = vst [vmem:[%s1251_s18 + $0xa0] sm:$0xff] %v508_v32 }
 0x17b   : > { %525 = vst [vmem:[%s1251_s18 + $0x28] sm:$0xff] %v493_v35  ;;  %541 = vst [vmem:[%s1251_s18 + $0xa8] sm:$0xff] %v509_v36  ;;  %v379_v41 = vpop.f32.mrb[6].mxu0  ;;  %v427_v42 = vpop.f32.mrb[6].mxu1 }
 0x17c   : > { %v494_v43 = vmul.f32 %v462_v37, %v379_v41  ;;  %v510_v44 = vmul.f32 %v478_v38, %v427_v42  ;;  %v381_v45 = vpop.f32.mrb[7].mxu0  ;;  %v429_v46 = vpop.f32.mrb[7].mxu1 }
 0x17d   : > { %v495_v47 = vmul.f32 %v463_v39, %v381_v45  ;;  %v511_v48 = vmul.f32 %v479_v40, %v429_v46 }
 0x17e   : > { %526 = vst [vmem:[%s1251_s18 + $0x30] sm:$0xff] %v494_v43  ;;  %542 = vst [vmem:[%s1251_s18 + $0xb0] sm:$0xff] %v510_v44 }
 0x17f   : > { %527 = vst [vmem:[%s1251_s18 + $0x38] sm:$0xff] %v495_v47  ;;  %543 = vst [vmem:[%s1251_s18 + $0xb8] sm:$0xff] %v511_v48  ;;  %v385_v53 = vpop.f32.mrb[8].mxu0  ;;  %v433_v54 = vpop.f32.mrb[8].mxu1 }
 0x180   : > { %v496_v55 = vmul.f32 %v464_v49, %v385_v53  ;;  %v512_v56 = vmul.f32 %v480_v50, %v433_v54  ;;  %v387_v57 = vpop.f32.mrb[9].mxu0  ;;  %v435_v58 = vpop.f32.mrb[9].mxu1 }
 0x181   : > { %v497_v59 = vmul.f32 %v465_v51, %v387_v57  ;;  %v513_v60 = vmul.f32 %v481_v52, %v435_v58 }
 0x182   : > { %528 = vst [vmem:[%s1251_s18 + $0x40] sm:$0xff] %v496_v55  ;;  %544 = vst [vmem:[%s1251_s18 + $0xc0] sm:$0xff] %v512_v56 }
 0x183   : > { %529 = vst [vmem:[%s1251_s18 + $0x48] sm:$0xff] %v497_v59  ;;  %545 = vst [vmem:[%s1251_s18 + $0xc8] sm:$0xff] %v513_v60  ;;  %v391_v2 = vpop.f32.mrb[10].mxu0  ;;  %v439_v3 = vpop.f32.mrb[10].mxu1 }
 0x184   : > { %v498_v4 = vmul.f32 %v466_v61, %v391_v2  ;;  %v514_v5 = vmul.f32 %v482_v62, %v439_v3  ;;  %v393_v6 = vpop.f32.mrb[11].mxu0  ;;  %v441_v7 = vpop.f32.mrb[11].mxu1 }
 0x185   : > { %v499_v8 = vmul.f32 %v467_v63, %v393_v6  ;;  %v515_v9 = vmul.f32 %v483_v1, %v441_v7 }
 0x186   : > { %530 = vst [vmem:[%s1251_s18 + $0x50] sm:$0xff] %v498_v4  ;;  %546 = vst [vmem:[%s1251_s18 + $0xd0] sm:$0xff] %v514_v5 }
 0x187   : > { %531 = vst [vmem:[%s1251_s18 + $0x58] sm:$0xff] %v499_v8  ;;  %547 = vst [vmem:[%s1251_s18 + $0xd8] sm:$0xff] %v515_v9  ;;  %v397_v13 = vpop.f32.mrb[12].mxu0  ;;  %v445_v14 = vpop.f32.mrb[12].mxu1 }
 0x188   : > { %v500_v15 = vmul.f32 %v468_v10, %v397_v13  ;;  %v516_v16 = vmul.f32 %v484_v11, %v445_v14  ;;  %v399_v17 = vpop.f32.mrb[13].mxu0  ;;  %v447_v18 = vpop.f32.mrb[13].mxu1 }
 0x189   : > { %v501_v19 = vmul.f32 %v469_v0, %v399_v17  ;;  %v517_v20 = vmul.f32 %v485_v12, %v447_v18 }
 0x18a   : > { %532 = vst [vmem:[%s1251_s18 + $0x60] sm:$0xff] %v500_v15  ;;  %548 = vst [vmem:[%s1251_s18 + $0xe0] sm:$0xff] %v516_v16 }
 0x18b   : > { %533 = vst [vmem:[%s1251_s18 + $0x68] sm:$0xff] %v501_v19  ;;  %549 = vst [vmem:[%s1251_s18 + $0xe8] sm:$0xff] %v517_v20  ;;  %v403_v25 = vpop.f32.mrb[14].mxu0  ;;  %v451_v26 = vpop.f32.mrb[14].mxu1 }
 0x18c   : > { %v502_v27 = vmul.f32 %v470_v21, %v403_v25  ;;  %v518_v28 = vmul.f32 %v486_v22, %v451_v26  ;;  %v405_v29 = vpop.f32.mrb[15].mxu0  ;;  %v453_v30 = vpop.f32.mrb[15].mxu1 }
 0x18d   : > { %v503_v31 = vmul.f32 %v471_v23, %v405_v29  ;;  %v519_v32 = vmul.f32 %v487_v24, %v453_v30 }
 0x18e   : > { %534 = vst [vmem:[%s1251_s18 + $0x70] sm:$0xff] %v502_v27  ;;  %550 = vst [vmem:[%s1251_s18 + $0xf0] sm:$0xff] %v518_v28 }
 0x18f   : > { %535 = vst [vmem:[%s1251_s18 + $0x78] sm:$0xff] %v503_v31  ;;  %551 = vst [vmem:[%s1251_s18 + $0xf8] sm:$0xff] %v519_v32 }
 0x190   : > { %917 = shalt.err (!%p914_p6)
}
 0x191   : > { %s918_s29 = scalar_lea.hbm %s1312_s6, 4096  ;;  %s922_s26 = scalar_lea.hbm %s1364_s3, 16384 }
 0x192   : > { %p919_p8 = scmp.ne.s32.totalorder %s1312_s6, %s918_s29  ;;  %p923_p4 = scmp.lt.u32.totalorder %s1312_s6, %s1364_s3 }
 0x193   : > { %p924_p10 = scmp.lt.u32.totalorder %s922_s26, %s918_s29  ;;  %p926_p3 = scmp.lt.u32.totalorder %s918_s29, %s1312_s6 }
 0x194   : > { %p920_p11 = pnand %p919_p8, %p1097_p12 }
 0x195   : > { %p925_p13 = por %p924_p10, %p923_p4 }
 0x196   : > { %p921_p0 = pneg %p920_p11 }
 0x197   : > { %p927_p7 = por %p926_p3, %p925_p13 }
 0x199   : > { %p928_p9 = pnand %p927_p7, %p921_p0 }
 0x19b   : > { %931 = shalt.err (!%p928_p9)
}
 0x19c   : > { %s989_s9 = smov 256   ;;  %s990_s4 = smov 16  }
 0x19d   : > { %755 = dma.vmem_to_hbm [thread:$0]  (%p1097_p12), %s1314_s30, 4096, %s1312_s6, %s553_s10, %s989_s9, %s989_s9, %s990_s4  }
 0x19e PF: > { %p775_p1 = scmp.ge.s32.totalorder %s978_s15, 2  ;;  %s582_s18 = sand.u32 1, %s966_s12  }
 0x19f   : > { %p1385_p5 = scmp.ne.s32.totalorder %s1372_s19, 0  ;;  %s583_s22 = scalar_lea.sflag [#allocation4], %s582_s18 }
 0x1a1   : > { %p769_p2 = pnand %p775_p1, %p1385_p5 }
 0x1a3   : > { %961 = dma.done.wait (!%p769_p2), %s583_s22, 4096  }
 0x1a4   : > { %963 = vsyncadd (!%p769_p2), %s583_s22, 4294963200  ;;  %p19_p6 = scmp.ge.s32.totalorder %s1064_s24, 6   ;;  %s1386_s12 = smov %s970_s13 }
 0x1a5   : > { %s1387_s13 = smov %s974_s14  ;;  %s1388_s14 = smov %s1093_s17 }
 0x1a6   : > { %s1389_s15 = smov %s1064_s24  ;;  %21 = sbr.rel (!%p19_p6) target bundleno = 9 (0x9), region = 94 }
 0x1ad   :  { %588 = vsyncpa [#allocation3], 1 }
 0x1ae   :  { %590 = vsyncpa [#allocation3 + $0x1], 1 }
 0x1af   :  { %591 = vsyncpa [#allocation6], 1 }
 0x1b0   :  { %593 = vsyncpa [#allocation6 + $0x1], 1 }
 0x1b1   :  { %594 = vsyncpa [#allocation4], 1 }
 0x1b2   :  { %596 = vsyncpa [#allocation4 + $0x1], 1 }

</bundles_post_ra>
